<compile_context>
chip_gen: v5e
topology: v5e:2x2
jax: 0.10.0
libtpu: 0.0.40
codegen_flags: <defaults>
</compile_context>

<pallas_src>
import functools

import jax
import jax.numpy as jnp
from jax.experimental import pallas as pl
from jax.experimental.pallas import tpu as pltpu

N_LANE = 128  # lane width / lane-dense output width


def _round_up(n: int, m: int) -> int:
    return (n + m - 1) // m * m


def duling_kernel(x_ref, w1_ref, b1_ref, wq_ref, bq_ref, q_ref):
    """q = relu(x @ W1 + b1) @ W_q + b_q   (dueling combo pre-folded into W_q)."""
    # feature = relu(x @ W1 + b1)   -> [tb, hidden_pad], f32 accumulate + f32 VPU
    feat = jnp.dot(x_ref[...], w1_ref[...], preferred_element_type=jnp.float32)
    feat = jnp.maximum(feat + b1_ref[...], 0.0)

    # Cast activation to the weight dtype (no-op for f32, bf16 for the bf16
    # path so the MXU runs its bf16-input mode); accumulate in f32.
    feat = feat.astype(wq_ref.dtype)
    q = jnp.dot(feat, wq_ref[...], preferred_element_type=jnp.float32) + bq_ref[...]
    q_ref[...] = q.astype(q_ref.dtype)


def prepare_params(w1, b1, wa, ba, wv, bv, *, dtype=jnp.float32):
    """One-time layout prep (NOT in the per-call path).

    Inputs use PyTorch Linear layout: W = (out, in), b = (out,).
    Returns:
      w1_t   [obs, H_pad]     dtype   (zero-padded hidden columns)
      b1_p   [1, H_pad]       f32
      w_head [H_pad, N_pad]   dtype   (dueling-folded Q weights, zero padded)
      b_head [1, N_pad]       f32
    """
    hidden, obs = w1.shape
    action_dim = wa.shape[0]
    n_pad = _round_up(max(action_dim, 1), N_LANE)
    h_pad = _round_up(hidden, N_LANE)

    w1 = jnp.asarray(w1, jnp.float32)
    b1 = jnp.asarray(b1, jnp.float32)
    wa = jnp.asarray(wa, jnp.float32)
    ba = jnp.asarray(ba, jnp.float32)
    wv = jnp.asarray(wv, jnp.float32).reshape(hidden)
    bv = jnp.asarray(bv, jnp.float32).reshape(())

    # Feature layer, hidden padded to a lane-dense width.
    w1_t = jnp.zeros((obs, h_pad), jnp.float32).at[:, :hidden].set(w1.T)
    b1_p = jnp.zeros((1, h_pad), jnp.float32).at[0, :hidden].set(b1)

    # Fold the dueling combination into a single Q head:
    #   q_j = feat . (Wa[j] + Wv - mean_k Wa[k]) + (ba[j] + bv - mean(ba))
    wa_t = wa.T  # [hidden, A]
    w_q = wa_t + wv[:, None] - jnp.mean(wa_t, axis=1, keepdims=True)  # [hidden, A]
    b_q = ba + bv - jnp.mean(ba)                                      # [A]

    w_head = jnp.zeros((h_pad, n_pad), jnp.float32).at[:hidden, :action_dim].set(w_q)
    b_head = jnp.zeros((1, n_pad), jnp.float32).at[0, :action_dim].set(b_q)

    return (
        w1_t.astype(dtype),
        b1_p,                 # biases stay f32 (added in f32 inside the kernel)
        w_head.astype(dtype),
        b_head,
    )


@functools.partial(jax.jit, static_argnames=("action_dim",))
def duling_net_forward(x, w1_t, b1, w_head, b_head, *, action_dim):
    """x: [B, obs_dim]. Params pre-laid-out via prepare_params()."""
    B, obs_dim = x.shape
    h_pad = w1_t.shape[1]
    n_pad = w_head.shape[1]
    io_dtype = w1_t.dtype

    x = x.astype(io_dtype)

    # Batch tile: big (HBM-bound kernel) but guarantee >= 2 grid steps when B
    # allows so the "parallel" axis shards across both v7x TensorCores.
    sublane = 16 if io_dtype == jnp.bfloat16 else 8
    tb_cap = 1024
    tb = max(sublane, min(tb_cap, _round_up(pl.cdiv(B, 2), sublane)))
    b_pad = _round_up(B, tb)
    if b_pad != B:
        x = jnp.pad(x, ((0, b_pad - B), (0, 0)))
    grid = (b_pad // tb,)

    itemsize = jnp.dtype(io_dtype).itemsize
    flops = 2 * b_pad * (obs_dim * h_pad + h_pad * n_pad)
    bytes_accessed = (
        itemsize * b_pad * obs_dim      # x read
        + itemsize * obs_dim * h_pad    # W1
        + 4 * h_pad                     # b1
        + itemsize * h_pad * n_pad      # W_q
        + 4 * n_pad                     # b_q
        + itemsize * b_pad * n_pad      # q write
    )

    q_padded = pl.pallas_call(
        duling_kernel,
        out_shape=jax.ShapeDtypeStruct((b_pad, n_pad), io_dtype),
        grid=grid,
        in_specs=[
            pl.BlockSpec((tb, obs_dim), lambda i: (i, 0)),     # x tile
            pl.BlockSpec((obs_dim, h_pad), lambda i: (0, 0)),  # W1 (replicated)
            pl.BlockSpec((1, h_pad), lambda i: (0, 0)),        # b1
            pl.BlockSpec((h_pad, n_pad), lambda i: (0, 0)),    # folded Q head W
            pl.BlockSpec((1, n_pad), lambda i: (0, 0)),        # folded Q head b
        ],
        out_specs=pl.BlockSpec((tb, n_pad), lambda i: (i, 0)),
        compiler_params=pltpu.CompilerParams(
            dimension_semantics=("parallel",),
        ),
        cost_estimate=pl.CostEstimate(
            flops=flops, transcendentals=0, bytes_accessed=bytes_accessed
        ),
    )(x, w1_t, b1, w_head, b_head)

    # Strip batch padding / zero lanes (consumers that can take the padded
    # lane-dense [B, 128] slab should, to skip this extra pass).
    return q_padded[:B, :action_dim]


def init_params(key, obs_dim, hidden_dim, action_dim):
    """Deterministic synthetic init (PyTorch Linear shapes: W=(out,in), b=(out,))."""
    k1, k2, k3, k4, k5, k6 = jax.random.split(key, 6)

    def unif(k, shape, fan_in):
        bound = 1.0 / jnp.sqrt(fan_in)
        return jax.random.uniform(k, shape, jnp.float32, -bound, bound)

    w1 = unif(k1, (hidden_dim, obs_dim), obs_dim)
    b1 = unif(k2, (hidden_dim,), obs_dim)
    wa = unif(k3, (action_dim, hidden_dim), hidden_dim)
    ba = unif(k4, (action_dim,), hidden_dim)
    wv = unif(k5, (1, hidden_dim), hidden_dim)
    bv = unif(k6, (1,), hidden_dim)
    return w1, b1, wa, ba, wv, bv


def reference_forward(x, w1, b1, wa, ba, wv, bv):
    feat = jnp.maximum(x @ w1.T + b1, 0.0)
    adv = feat @ wa.T + ba
    val = feat @ wv.T + bv
    return val + adv - jnp.mean(adv, axis=-1, keepdims=True)


if __name__ == "__main__":
    obs_dim, hidden_dim, action_dim = 16, 32, 6
    batch = 8

    key = jax.random.PRNGKey(0)
    kx, kp = jax.random.split(key)
    x = jax.random.normal(kx, (batch, obs_dim), jnp.float32)
    params = init_params(kp, obs_dim, hidden_dim, action_dim)
    q_ref = reference_forward(x, *params)

    # f32 path (strict check against the unfused reference).
    prep_f32 = prepare_params(*params, dtype=jnp.float32)
    q_f32 = jax.block_until_ready(
        duling_net_forward(x, *prep_f32, action_dim=action_dim)
    )
    assert q_f32.shape == (batch, action_dim)
    assert jnp.allclose(q_f32, q_ref, atol=1e-5, rtol=1e-5), "f32 mismatch vs reference"

    # bf16-I/O path (bandwidth-bound win on v6e/v7x; safe on v5e since all
    # post-matmul arithmetic stays f32).  Loose tolerance vs the f32 reference.
    prep_bf16 = prepare_params(*params, dtype=jnp.bfloat16)
    q_bf16 = jax.block_until_ready(
        duling_net_forward(x, *prep_bf16, action_dim=action_dim)
    )
    assert q_bf16.shape == (batch, action_dim)
    assert jnp.allclose(
        q_bf16.astype(jnp.float32), q_ref, atol=5e-2, rtol=5e-2
    ), "bf16 mismatch vs reference"

    print("KERNEL_OK")
</pallas_src>

<mosaic_0001>
module attributes {stable_mosaic.version = 11 : i64} {
  func.func @duling_kernel(%arg0: i32, %arg1: memref<8x16xf32, #tpu.memory_space<vmem>>, %arg2: memref<16x128xf32, #tpu.memory_space<vmem>>, %arg3: memref<1x128xf32, #tpu.memory_space<vmem>>, %arg4: memref<128x128xf32, #tpu.memory_space<vmem>>, %arg5: memref<1x128xf32, #tpu.memory_space<vmem>>, %arg6: memref<8x128xf32, #tpu.memory_space<vmem>>) attributes {dimension_semantics = [#tpu.dimension_semantics<parallel>], iteration_bounds = array<i64: 1>, scalar_prefetch = 0 : i64, scratch_operands = 0 : i64, tpu.core_type = #tpu.core_type<tc>, window_params = [{transform_indices = @transform_0, window_bounds = array<i64: 8, 16>}, {pipeline_mode = #tpu.pipeline_mode<synchronous>, transform_indices = @transform_1, window_bounds = array<i64: 16, 128>}, {pipeline_mode = #tpu.pipeline_mode<synchronous>, transform_indices = @transform_2, window_bounds = array<i64: 1, 128>}, {pipeline_mode = #tpu.pipeline_mode<synchronous>, transform_indices = @transform_3, window_bounds = array<i64: 128, 128>}, {pipeline_mode = #tpu.pipeline_mode<synchronous>, transform_indices = @transform_4, window_bounds = array<i64: 1, 128>}, {transform_indices = @transform_5, window_bounds = array<i64: 8, 128>}]} {
    %c0 = arith.constant 0 : index
    %c0_0 = arith.constant 0 : index
    %0 = vector.load %arg1[%c0, %c0_0] : memref<8x16xf32, #tpu.memory_space<vmem>>, vector<8x16xf32>
    %c0_1 = arith.constant 0 : index
    %c0_2 = arith.constant 0 : index
    %1 = vector.load %arg2[%c0_1, %c0_2] : memref<16x128xf32, #tpu.memory_space<vmem>>, vector<16x128xf32>
    %cst = arith.constant dense<0.000000e+00> : vector<8x128xf32>
    %2 = tpu.matmul %0, %1, %cst {dimension_numbers = #tpu.dot_dimension_numbers<[1], [0], [0], [1], [0, 0, 1, 1], [], []>} : vector<8x16xf32>, vector<16x128xf32>, vector<8x128xf32> -> vector<8x128xf32>
    %c0_3 = arith.constant 0 : index
    %c0_4 = arith.constant 0 : index
    %3 = vector.load %arg3[%c0_3, %c0_4] : memref<1x128xf32, #tpu.memory_space<vmem>>, vector<1x128xf32>
    %4 = vector.broadcast %3 : vector<1x128xf32> to vector<8x128xf32>
    %5 = arith.addf %2, %4 : vector<8x128xf32>
    %cst_5 = arith.constant 0.000000e+00 : f32
    %6 = vector.broadcast %cst_5 : f32 to vector<8x128xf32>
    %7 = arith.maximumf %5, %6 : vector<8x128xf32>
    %c0_6 = arith.constant 0 : index
    %c0_7 = arith.constant 0 : index
    %8 = vector.load %arg4[%c0_6, %c0_7] : memref<128x128xf32, #tpu.memory_space<vmem>>, vector<128x128xf32>
    %cst_8 = arith.constant dense<0.000000e+00> : vector<8x128xf32>
    %9 = tpu.matmul %7, %8, %cst_8 {dimension_numbers = #tpu.dot_dimension_numbers<[1], [0], [0], [1], [0, 0, 1, 1], [], []>} : vector<8x128xf32>, vector<128x128xf32>, vector<8x128xf32> -> vector<8x128xf32>
    %c0_9 = arith.constant 0 : index
    %c0_10 = arith.constant 0 : index
    %10 = vector.load %arg5[%c0_9, %c0_10] : memref<1x128xf32, #tpu.memory_space<vmem>>, vector<1x128xf32>
    %11 = vector.broadcast %10 : vector<1x128xf32> to vector<8x128xf32>
    %12 = arith.addf %9, %11 : vector<8x128xf32>
    %c0_11 = arith.constant 0 : index
    %c0_12 = arith.constant 0 : index
    %13 = vector.load %arg6[%c0_11, %c0_12] : memref<8x128xf32, #tpu.memory_space<vmem>>, vector<8x128xf32>
    tpu.vector_store %arg6[%c0_11, %c0_12], %12 {strides = array<i32>} : memref<8x128xf32, #tpu.memory_space<vmem>>, vector<8x128xf32>,
    return
  }
  func.func @transform_0(%arg0: i32) -> (i32, i32) {
    %c0_i32 = arith.constant 0 : i32
    %c0_i32_0 = arith.constant 0 : i32
    return %arg0, %c0_i32 : i32, i32
  }
  func.func @transform_1(%arg0: i32) -> (i32, i32) {
    %c0_i32 = arith.constant 0 : i32
    %c0_i32_0 = arith.constant 0 : i32
    %c0_i32_1 = arith.constant 0 : i32
    return %c0_i32, %c0_i32_0 : i32, i32
  }
  func.func @transform_2(%arg0: i32) -> (i32, i32) {
    %c0_i32 = arith.constant 0 : i32
    %c0_i32_0 = arith.constant 0 : i32
    %c0_i32_1 = arith.constant 0 : i32
    return %c0_i32, %c0_i32_0 : i32, i32
  }
  func.func @transform_3(%arg0: i32) -> (i32, i32) {
    %c0_i32 = arith.constant 0 : i32
    %c0_i32_0 = arith.constant 0 : i32
    %c0_i32_1 = arith.constant 0 : i32
    return %c0_i32, %c0_i32_0 : i32, i32
  }
  func.func @transform_4(%arg0: i32) -> (i32, i32) {
    %c0_i32 = arith.constant 0 : i32
    %c0_i32_0 = arith.constant 0 : i32
    %c0_i32_1 = arith.constant 0 : i32
    return %c0_i32, %c0_i32_0 : i32, i32
  }
  func.func @transform_5(%arg0: i32) -> (i32, i32) {
    %c0_i32 = arith.constant 0 : i32
    %c0_i32_0 = arith.constant 0 : i32
    return %arg0, %c0_i32 : i32, i32
  }
}

</mosaic_0001>

<bundles_post_ra>
// kernel: duling_net_forward.1
= control target key start
LH: loop header
LB: loop body
LE: loop exit
PB: predicated region body
PF: predicated region fallthrough
CT: control target
= control target key end

     0   :  { %10 = vsyncpa [#allocation3], 0  ;;  %s322_s0 = inlined_call_operand.hbm [shape: f32[8,16], index: 0, kind: input, shape index: {}]   ;;  %s323_s1 = inlined_call_operand.hbm [shape: f32[16,128], index: 1, kind: input, shape index: {}]   ;;  %s324_s2 = inlined_call_operand.vmem [shape: f32[1,128], index: 2, kind: input, shape index: {}]   ;;  %s325_s3 = inlined_call_operand.hbm [shape: f32[128,128], index: 3, kind: input, shape index: {}]   ;;  %s326_s4 = inlined_call_operand.vmem [shape: f32[1,128], index: 4, kind: input, shape index: {}]   ;;  %s327_s5 = inlined_call_operand.hbm [shape: f32[8,128], index: 5, kind: output, shape index: {}]  }
   0x1   :  { %11 = vsyncpa [#allocation6], 0  ;;  %s28_s20 = sshll.u32 %s323_s1, 4  ;;  %s29_s20 = int_to_ptr.hbm [resolvable:$true] %s28_s20 }
   0x2   :  { %12 = vsyncpa [#allocation4], 0  ;;  %s268_s21 = smov [#allocation5]   ;;  %s18_s25 = sshll.u32 %s322_s0, 4  ;;  %s19_s25 = int_to_ptr.hbm [resolvable:$true] %s18_s25 }
   0x3   :  { %s30_s22 = sshll.u32 %s268_s21, 4  ;;  %s269_s26 = smov 128   ;;  %s31_s22 = int_to_ptr.vmem [resolvable:$true] %s30_s22 }
   0x4   :  { %s270_s27 = smov 8   ;;  %s271_s28 = smov [#allocation2]  }
   0x5   :  { %36 = dma.hbm_to_vmem [thread:$0]  %s29_s20, 256, %s31_s22, [#allocation6], %s269_s26, %s269_s26, %s270_s27  }
   0x6   :  { %s20_s29 = sshll.u32 %s271_s28, 4  ;;  %s43_s7 = sshll.u32 %s325_s3, 4  ;;  %s21_s29 = int_to_ptr.vmem [resolvable:$true] %s20_s29  ;;  %s44_s7 = int_to_ptr.hbm [resolvable:$true] %s43_s7 }
   0x7   :  { %23 = dma.hbm_to_vmem [thread:$0]  %s19_s25, 128, %s21_s29, [#allocation3]  }
   0x8   :  { %s272_s1 = smov [#allocation7]  }
   0x9   :  { %s45_s8 = sshll.u32 %s272_s1, 4  ;;  %s46_s8 = int_to_ptr.vmem [resolvable:$true] %s45_s8 }
   0xa   :  { %51 = dma.hbm_to_vmem [thread:$0]  %s44_s7, 2048, %s46_s8, [#allocation6], %s269_s26, %s269_s26, %s270_s27  }
   0xb   :  { %262 = dma.done.wait [#allocation3], 128  }
   0xc   :  { %263 = vsyncadd [#allocation3], 4294967168 }
   0xd   :  { %264 = dma.done.wait [#allocation6], 2304  }
   0xe   :  { %265 = vsyncadd [#allocation6], 4294964992  ;;  %v68_v0 = vld [vmem:[#allocation5 + $0x8] sm:$0xff]  ;;  %v67_v1 = vld [vmem:[#allocation5] sm:$0xff]  ;;  %vm73_vm0 = vcmask 130048   ;;  %s273_s11 = smov [#allocation8]  }
   0xf   :  { %91 = vmatpush.msra.mxu0 %v68_v0  ;;  %v66_v2 = vld [vmem:[#allocation2] sm:$0xff]  ;;  %v113_v3 = vld [vmem:[#allocation7 + $0x78] sm:$0xff]  ;;  %v112_v4 = vld [vmem:[#allocation7 + $0x70] sm:$0xff]  ;;  %s144_s12 = sshll.u32 %s273_s11, 4  ;;  %s146_s15 = sshll.u32 %s327_s5, 4  ;;  %s145_s12 = int_to_ptr.vmem [resolvable:$true] %s144_s12  ;;  %s147_s15 = int_to_ptr.hbm [resolvable:$true] %s146_s15 }
  0x10   :  { %118 = vmatpush.msra.mxu1 %v113_v3  ;;  %v111_v5 = vld [vmem:[#allocation7 + $0x68] sm:$0xff]  ;;  %v110_v6 = vld [vmem:[#allocation7 + $0x60] sm:$0xff]  ;;  %v109_v7 = vld [vmem:[#allocation7 + $0x58] sm:$0xff] }
  0x11   :  { %92 = vmatpush.msra.mxu0 %v67_v1  ;;  %v108_v8 = vld [vmem:[#allocation7 + $0x50] sm:$0xff]  ;;  %v107_v9 = vld [vmem:[#allocation7 + $0x48] sm:$0xff]  ;;  %v106_v10 = vld [vmem:[#allocation7 + $0x40] sm:$0xff] }
  0x12   :  { %157 = vmatmul.msk.f32.vlgmr.msra.gmra.mxu0 %vm73_vm0, %v66_v2  ;;  %119 = vmatpush.msra.mxu1 %v112_v4  ;;  %v105_v11 = vld [vmem:[#allocation7 + $0x38] sm:$0xff]  ;;  %v104_v12 = vld [vmem:[#allocation7 + $0x30] sm:$0xff]  ;;  %v103_v13 = vld [vmem:[#allocation7 + $0x28] sm:$0xff] }
  0x13   :  { %v102_v14 = vld [vmem:[#allocation7 + $0x20] sm:$0xff]  ;;  %v101_v15 = vld [vmem:[#allocation7 + $0x18] sm:$0xff]  ;;  %v100_v16 = vld [vmem:[#allocation7 + $0x10] sm:$0xff] }
  0x14   :  { %120 = vmatpush.msra.mxu1 %v111_v5  ;;  %v99_v17 = vld [vmem:[#allocation7 + $0x8] sm:$0xff]  ;;  %v98_v18 = vld [vmem:[#allocation7] sm:$0xff] }
  0x15   :  { %v164_v19 = vld [vmem:[%s324_s2] ss:$0 sm:$0xff] }
  0x16   :  { %121 = vmatpush.msra.mxu1 %v110_v6  ;;  %v165_v23 = vld [vmem:[%s326_s4] ss:$0 sm:$0xff] }
  0x18   :  { %122 = vmatpush.msra.mxu1 %v109_v7 }
  0x1a   :  { %123 = vmatpush.msra.mxu1 %v108_v8 }
  0x1c   :  { %124 = vmatpush.msra.mxu1 %v107_v9 }
  0x1e   :  { %125 = vmatpush.msra.mxu1 %v106_v10 }
  0x20   :  { %126 = vmatpush.msra.mxu1 %v105_v11 }
  0x22   :  { %127 = vmatpush.msra.mxu1 %v104_v12 }
  0x24   :  { %128 = vmatpush.msra.mxu1 %v103_v13 }
  0x26   :  { %129 = vmatpush.msra.mxu1 %v102_v14 }
  0x28   :  { %130 = vmatpush.msra.mxu1 %v101_v15 }
  0x2a   :  { %131 = vmatpush.msra.mxu1 %v100_v16 }
  0x2c   :  { %132 = vmatpush.msra.mxu1 %v99_v17 }
  0x2e   :  { %133 = vmatpush.msra.mxu1 %v98_v18 }
  0x8f   :  { %v94_v20 = vpop.f32.mrf.mxu0 }
  0x90   :  { %v95_v21 = vadd.f32 %v164_v19, %v94_v20 }
  0x92   :  { %v97_v22 = vmax.f32 %v95_v21, 0.0 }
  0x94   :  { %134 = vmatmul.f32.vlgmr.msra.gmra.mxu1 %v97_v22 }
 0x111   :  { %v135_v24 = vpop.f32.mrf.mxu1 }
 0x112   :  { %v136_v25 = vadd.f32 %v165_v23, %v135_v24 }
 0x114   :  { %138 = vst [vmem:[#allocation8] sm:$0xff] %v136_v25 }
 0x115   :  { %149 = dma.vmem_to_hbm [thread:$0]  %s145_s12, 128, %s147_s15, [#allocation4]  }
 0x116   :  { %266 = dma.done.wait [#allocation4], 128  }
 0x117   :  { %267 = vsyncadd [#allocation4], 4294967168 }
 0x118   :  { %154 = vsyncpa [#allocation3], 1 }
 0x119   :  { %155 = vsyncpa [#allocation6], 1 }
 0x11a   :  { %156 = vsyncpa [#allocation4], 1 }

</bundles_post_ra>
